<compile_context>
chip_gen: v7x
topology: tpu7x:2x2x1
jax: 0.10.0
libtpu: 0.0.40
codegen_flags: <defaults>
</compile_context>

<pallas_src>
import functools

import jax
import jax.numpy as jnp
from jax import lax
from jax.experimental import pallas as pl
from jax.experimental.pallas import tpu as pltpu

# sys.float_info.epsilon as a *Python* float.  (A jnp scalar created at module
# scope becomes a captured constant inside the kernel, which Pallas rejects.)
_EPS = 2.220446049250313e-16

LANE = 128
MAX_BLOCK_ROWS = 2048  # (2048,128) f32 = 1 MiB/block -> 4 MiB double-buffered for 2 inputs.


def _kld_kernel(sums_ref, inp_ref, trg_ref, out_ref, *, total_rows, block_rows, mask_last):
    """One grid step: partial sum of trg * log(eps + trg_n/(inp_n+eps)) for this block.

    sums_ref: (2,) f32 scalar-prefetch in SMEM -> [sum(inp), sum(trg)].
    """
    t = pl.program_id(0)
    inv_si = 1.0 / sums_ref[0]
    inv_st = 1.0 / sums_ref[1]

    inp = inp_ref[...]
    trg = trg_ref[...]

    # trg_n factored out of the outer product: accumulate trg * log(...),
    # divide by sum(trg) once in the wrapper.  eps placement matches the reference.
    ratio = (trg * inv_st) / (inp * inv_si + _EPS)
    term = trg * jnp.log(_EPS + ratio)

    if mask_last:
        # Last block may extend past the array; zero rows beyond `total_rows`.
        row = lax.broadcasted_iota(jnp.int32, term.shape, 0)
        term = jnp.where(t * block_rows + row < total_rows, term, 0.0)

    # Lane/sublane-dense per-block partial sum: (block_rows,128) -> (8,128).
    # (Free vreg re-grouping + VPU adds; single cross-lane reduce done in wrapper.)
    out_ref[...] = term.reshape(-1, 8, LANE).sum(axis=0)


def kld_loss(saliency_map, gtruth):
    """Pallas implementation of LOSS.forward (KLD loss). Inputs: NCHW arrays."""
    inp = saliency_map.reshape(-1).astype(jnp.float32)
    trg = gtruth.reshape(-1).astype(jnp.float32)
    n = inp.shape[0]

    rows = -(-n // LANE)                                  # ceil(n / 128)
    block_rows = min(MAX_BLOCK_ROWS, ((rows + 7) // 8) * 8)
    num_tiles = -(-rows // block_rows)
    mask_last = (rows % block_rows) != 0

    def to_rows(x):
        pad = rows * LANE - n
        if pad:
            # TODO(synk): only hit when numel % 128 != 0; pads to a lane multiple
            # (padded zeros contribute exactly 0 to the loss).
            x = jnp.pad(x, (0, pad))
        return x.reshape(rows, LANE)

    inp2 = to_rows(inp)
    trg2 = to_rows(trg)

    # Global sums computed once in XLA (inputs are read twice either way).
    s_inp = jnp.sum(inp)
    s_trg = jnp.sum(trg)
    sums = jnp.stack([s_inp, s_trg]).astype(jnp.float32)

    kernel = functools.partial(
        _kld_kernel, total_rows=rows, block_rows=block_rows, mask_last=mask_last
    )

    partials = pl.pallas_call(
        kernel,
        out_shape=jax.ShapeDtypeStruct((num_tiles * 8, LANE), jnp.float32),
        grid_spec=pltpu.PrefetchScalarGridSpec(
            num_scalar_prefetch=1,
            grid=(num_tiles,),
            in_specs=[
                pl.BlockSpec((block_rows, LANE), lambda t, s: (t, 0)),
                pl.BlockSpec((block_rows, LANE), lambda t, s: (t, 0)),
            ],
            out_specs=pl.BlockSpec((8, LANE), lambda t, s: (t, 0)),
        ),
        compiler_params=pltpu.CompilerParams(
            dimension_semantics=("parallel",),
        ),
    )(sums, inp2, trg2)

    # Final tiny reduce + the factored-out 1/sum(trg).
    return jnp.sum(partials) / s_trg


def _kld_ref(inp, trg):
    """Pure-JAX reference mirroring the PyTorch code exactly."""
    inp = inp.astype(jnp.float32)
    trg = trg.astype(jnp.float32)
    inp_n = inp / jnp.sum(inp)
    trg_n = trg / jnp.sum(trg)
    return jnp.sum(trg_n * jnp.log(_EPS + trg_n / (inp_n + _EPS)))


if __name__ == "__main__":
    key = jax.random.PRNGKey(0)
    k1, k2 = jax.random.split(key)
    # Saliency maps: NCHW, small shapes, positive values (as real saliency maps are).
    saliency_map = jax.random.uniform(k1, (2, 1, 16, 16), dtype=jnp.float32) + 1e-3
    gtruth = jax.random.uniform(k2, (2, 1, 16, 16), dtype=jnp.float32) + 1e-3

    loss = kld_loss(saliency_map, gtruth)
    loss = jax.block_until_ready(loss)

    ref = _kld_ref(saliency_map, gtruth)
    assert jnp.allclose(loss, ref, rtol=1e-4, atol=1e-6), (loss, ref)

    print("KERNEL_OK")
</pallas_src>

<mosaic_0001>
module attributes {stable_mosaic.version = 11 : i64} {
  func.func @_kld_kernel(%arg0: i32, %arg1: memref<2xf32, #tpu.memory_space<smem>>, %arg2: memref<8x128xf32, #tpu.memory_space<vmem>>, %arg3: memref<8x128xf32, #tpu.memory_space<vmem>>, %arg4: memref<8x128xf32, #tpu.memory_space<vmem>>) attributes {dimension_semantics = [#tpu.dimension_semantics<parallel>], iteration_bounds = array<i64: 1>, scalar_prefetch = 1 : i64, scratch_operands = 0 : i64, tpu.core_type = #tpu.core_type<tc>, window_params = [{transform_indices = @transform_0, window_bounds = array<i64: 8, 128>}, {transform_indices = @transform_1, window_bounds = array<i64: 8, 128>}, {transform_indices = @transform_2, window_bounds = array<i64: 8, 128>}]} {
    %c0 = arith.constant 0 : index
    %0 = memref.load %arg1[%c0] : memref<2xf32, #tpu.memory_space<smem>>
    %cst = arith.constant 1.000000e+00 : f32
    %1 = arith.divf %cst, %0 : f32
    %c1 = arith.constant 1 : index
    %2 = memref.load %arg1[%c1] : memref<2xf32, #tpu.memory_space<smem>>
    %cst_0 = arith.constant 1.000000e+00 : f32
    %3 = arith.divf %cst_0, %2 : f32
    %c0_1 = arith.constant 0 : index
    %c0_2 = arith.constant 0 : index
    %4 = vector.load %arg2[%c0_1, %c0_2] : memref<8x128xf32, #tpu.memory_space<vmem>>, vector<8x128xf32>
    %c0_3 = arith.constant 0 : index
    %c0_4 = arith.constant 0 : index
    %5 = vector.load %arg3[%c0_3, %c0_4] : memref<8x128xf32, #tpu.memory_space<vmem>>, vector<8x128xf32>
    %6 = vector.broadcast %3 : f32 to vector<8x128xf32>
    %7 = arith.mulf %5, %6 : vector<8x128xf32>
    %8 = vector.broadcast %1 : f32 to vector<8x128xf32>
    %9 = arith.mulf %4, %8 : vector<8x128xf32>
    %cst_5 = arith.constant 2.22044605E-16 : f32
    %10 = vector.broadcast %cst_5 : f32 to vector<8x128xf32>
    %11 = arith.addf %9, %10 : vector<8x128xf32>
    %12 = arith.divf %7, %11 : vector<8x128xf32>
    %cst_6 = arith.constant 2.22044605E-16 : f32
    %13 = vector.broadcast %cst_6 : f32 to vector<8x128xf32>
    %14 = arith.addf %13, %12 : vector<8x128xf32>
    %15 = math.log %14 : vector<8x128xf32>
    %16 = arith.mulf %5, %15 : vector<8x128xf32>
    %17 = tpu.iota {dimensions = array<i32: 0>} : vector<8x128xi32>
    %c8_i32 = arith.constant 8 : i32
    %18 = arith.muli %arg0, %c8_i32 : i32
    %19 = vector.broadcast %18 : i32 to vector<8x128xi32>
    %20 = arith.addi %19, %17 : vector<8x128xi32>
    %c4_i32 = arith.constant 4 : i32
    %21 = vector.broadcast %c4_i32 : i32 to vector<8x128xi32>
    %22 = arith.cmpi slt, %20, %21 : vector<8x128xi32>
    %cst_7 = arith.constant 0.000000e+00 : f32
    %23 = vector.broadcast %cst_7 : f32 to vector<8x128xf32>
    %24 = arith.select %22, %16, %23 : vector<8x128xi1>, vector<8x128xf32>
    %25 = vector.shape_cast %24 : vector<8x128xf32> to vector<1x8x128xf32>
    %cst_8 = arith.constant dense<0.000000e+00> : vector<8x128xf32>
    %26 = vector.multi_reduction <add>, %25, %cst_8 [0] : vector<1x8x128xf32> to vector<8x128xf32>
    %c0_9 = arith.constant 0 : index
    %c0_10 = arith.constant 0 : index
    %27 = vector.load %arg4[%c0_9, %c0_10] : memref<8x128xf32, #tpu.memory_space<vmem>>, vector<8x128xf32>
    tpu.vector_store %arg4[%c0_9, %c0_10], %26 {strides = array<i32>} : memref<8x128xf32, #tpu.memory_space<vmem>>, vector<8x128xf32>,
    return
  }
  func.func @transform_0(%arg0: i32, %arg1: memref<2xf32, #tpu.memory_space<smem>>) -> (i32, i32) {
    %c0_i32 = arith.constant 0 : i32
    %c0_i32_0 = arith.constant 0 : i32
    return %arg0, %c0_i32 : i32, i32
  }
  func.func @transform_1(%arg0: i32, %arg1: memref<2xf32, #tpu.memory_space<smem>>) -> (i32, i32) {
    %c0_i32 = arith.constant 0 : i32
    %c0_i32_0 = arith.constant 0 : i32
    return %arg0, %c0_i32 : i32, i32
  }
  func.func @transform_2(%arg0: i32, %arg1: memref<2xf32, #tpu.memory_space<smem>>) -> (i32, i32) {
    %c0_i32 = arith.constant 0 : i32
    %c0_i32_0 = arith.constant 0 : i32
    return %arg0, %c0_i32 : i32, i32
  }
}

</mosaic_0001>

<bundles_post_ra>
// kernel: tpu_custom_call.1
= control target key start
LH: loop header
LB: loop body
LE: loop exit
PB: predicated region body
PF: predicated region fallthrough
CT: control target
= control target key end

     0   :  { %s218_s0 = inlined_call_operand.hbm [shape: f32[2], index: 0, kind: input, shape index: {}]   ;;  %s219_s1 = inlined_call_operand.hbm [shape: f32[4,128], index: 1, kind: input, shape index: {}]   ;;  %s220_s2 = inlined_call_operand.vmem [shape: f32[4,128], index: 2, kind: input, shape index: {}]   ;;  %s221_s3 = inlined_call_operand.hbm [shape: f32[8,128], index: 3, kind: output, shape index: {}]  }
   0x1   :  { %s94_s14 = scalar_lea.hbm %s218_s0, 16 }
   0x2   :  { %p95_p0 = scmp.ne.s32.totalorder %s218_s0, %s94_s14  ;;  %p98_p1 = scmp.lt.u32.totalorder %s94_s14, %s218_s0 }
   0x4   :  { %p100_p2 = pnand %p98_p1, %p95_p0 }
   0x6   :  { %103 = shalt.err (!%p100_p2)  }
   0x7   :  { %s154_s19 = smov [#allocation3]  }
   0x8   :  { %9 = dma.hbm_to_smem %s218_s0, 16, %s154_s19, [#allocation2] }
   0x9   :  { %148 = dma.done.wait [#allocation2], 16 }
   0xa   :  { %149 = vsyncadd [#allocation2], 4294967280 }
   0xb   :  { %11 = sfence }
   0xc   :  { %12 = vsyncpa [#allocation5], 0 }
   0xd   :  { %13 = vsyncpa [#allocation6], 0 }
   0xe   :  { %18 = vsyncadd [#allocation5], 64  ;;  %s155_s22 = smov [#allocation4]   ;;  %s104_s26 = scalar_lea.hbm %s219_s1, 64 }
   0xf   :  { %s19_s23 = sshll.u32 %s155_s22, 4  ;;  %p105_p3 = scmp.ne.s32.totalorder %s219_s1, %s104_s26  ;;  %s20_s23 = int_to_ptr.vmem [resolvable:$true] %s19_s23 }
  0x10   :  { %p108_p4 = scmp.lt.u32.totalorder %s104_s26, %s219_s1 }
  0x12   :  { %p110_p5 = pnand %p108_p4, %p105_p3 }
  0x14   :  { %113 = shalt.err (!%p110_p5)
}
  0x15   :  { %s114_s0 = scalar_lea.vmem %s20_s23, 64  ;;  %s118_s4 = scalar_lea.vmem %s20_s23, 128 }
  0x16   :  { %p115_p6 = scmp.ne.s32.totalorder %s20_s23, %s114_s0  ;;  %p119_p7 = scmp.lt.s32.totalorder %s20_s23, %s20_s23 }
  0x17   :  { %p120_p8 = scmp.lt.s32.totalorder %s118_s4, %s114_s0 }
  0x19   :  { %p121_p9 = por %p120_p8, %p119_p7 }
  0x1b   :  { %p122_p10 = pnand %p121_p9, %p115_p6 }
  0x1d   :  { %125 = shalt.err (!%p122_p10)
}
  0x1e   :  { %s156_s5 = smov 64   ;;  %s157_s6 = smov 4  }
  0x1f   :  { %25 = dma.hbm_to_vmem [thread:$0]  %s219_s1, 64, %s20_s23, [#allocation5], %s156_s5, %s156_s5, %s157_s6  }
  0x20   :  { %150 = dma.done.wait [#allocation5], 128  }
  0x21   :  { %151 = vsyncadd [#allocation5], 4294967168  ;;  %s76_s9 = sld [smem:[#allocation3 + $0x1]]  ;;  %s31_s10 = sld [smem:[#allocation3]]  ;;  %v39_v4 = vld [vmem:[#allocation4] sm:$0xff]  ;;  %v40_v8 = vld [vmem:[%s220_s2] sm:$0xff]  ;;  %v52_v14 = vlaneseq }
  0x22   :  { %s158_s14 = smov [#allocation7]  }
  0x23   :  { %v53_v15 = vshrl.u32 %v52_v14, 7  ;;  %s67_s15 = sshll.u32 %s158_s14, 4  ;;  %s68_s15 = int_to_ptr.vmem [resolvable:$true] %s67_s15 }
  0x24   :  { %s126_s16 = scalar_lea.vmem %s68_s15, 128  ;;  %p131_p12 = scmp.lt.s32.totalorder %s68_s15, %s68_s15 }
  0x25   :  { %vm57_vm0 = vcmp.lt.s32.totalorder %v53_v15, 4  ;;  %p127_p11 = scmp.ne.s32.totalorder %s68_s15, %s126_s16  ;;  %p132_p13 = scmp.lt.s32.totalorder %s126_s16, %s126_s16 }
  0x27   :  { %v36_v0 = vstv %s76_s9  ;;  %v32_v1 = vstv %s31_s10  ;;  %p133_p0 = por %p132_p13, %p131_p12 }
  0x28   :  { %86 = vrcp.f32 %v36_v0 }
  0x29   :  { %88 = vrcp.f32 %v32_v1  ;;  %p134_p1 = pnand %p133_p0, %p127_p11 }
  0x32   :  { %v87_v2 = vpop.eup %86 }
  0x33   :  { %v89_v3 = vpop.eup %88 }
  0x34   :  { %77 = vpush %v89_v3 }
  0x35   :  { %79 = vpush %v87_v2 }
  0x65   :  { %s78_s11 = spop %77 }
  0x66   :  { %v43_v5 = vstv %s78_s11  ;;  %s80_s12 = spop %79 }
  0x67   :  { %v44_v6 = vmul.f32 %v43_v5, %v39_v4  ;;  %v41_v9 = vstv %s80_s12 }
  0x68   :  { %v42_v10 = vmul.f32 %v41_v9, %v40_v8 }
  0x69   :  { %v45_v7 = vadd.f32 2.220446e-16, %v44_v6 }
  0x6b   :  { %90 = vrcp.f32 %v45_v7 }
  0x75   :  { %v91_v11 = vpop.eup %90 }
  0x76   :  { %v47_v12 = vmul.f32 %v91_v11, %v42_v10 }
  0x78   :  { %v48_v13 = vadd.f32 2.220446e-16, %v47_v12 }
  0x7a   :  { %92 = vlog2.f32 %v48_v13 }
  0x84   :  { %v93_v16 = vpop.eup %92 }
  0x85   :  { %v50_v17 = vmul.f32 0.6931472, %v93_v16 }
  0x87   :  { %v51_v18 = vmul.f32 %v50_v17, %v40_v8 }
  0x89   :  { %v58_v19 = vsel %vm57_vm0, %v51_v18, 0.0 }
  0x8a   :  { %60 = vst [vmem:[#allocation7] sm:$0xff] %v58_v19 }
  0x8b   :  { %137 = shalt.err (!%p134_p1)
}
  0x8c   :  { %s138_s18 = scalar_lea.hbm %s221_s3, 128 }
  0x8d   :  { %p139_p2 = scmp.ne.s32.totalorder %s221_s3, %s138_s18  ;;  %p142_p3 = scmp.lt.u32.totalorder %s138_s18, %s221_s3 }
  0x8f   :  { %p144_p4 = pnand %p142_p3, %p139_p2 }
  0x91   :  { %147 = shalt.err (!%p144_p4)
}
  0x92   :  { %70 = dma.vmem_to_hbm [thread:$0]  %s68_s15, 128, %s221_s3, [#allocation6]  }
  0x93   :  { %152 = dma.done.wait [#allocation6], 128  }
  0x94   :  { %153 = vsyncadd [#allocation6], 4294967168 }
  0x95   :  { %74 = vsyncpa [#allocation5], 1 }
  0x96   :  { %75 = vsyncpa [#allocation6], 1 }

</bundles_post_ra>
